<compile_context>
chip_gen: v7x
topology: tpu7x:2x2x1
jax: 0.10.0
libtpu: 0.0.40
codegen_flags: <defaults>
</compile_context>

<pallas_src>
import jax
import jax.numpy as jnp
from jax.experimental import pallas as pl
from jax.experimental.pallas import tpu as pltpu

LP_DTYPE = jnp.float8_e4m3fn   # lp_dtype
HP_DTYPE = jnp.float32         # hp_dtype for the demo (kernel is dtype-generic)
FP8_E4M3_MAX = 448.0


def _round_up(v, m):
    return ((v + m - 1) // m) * m


def _cdiv(a, b):
    return (a + b - 1) // b


def _vmem_capacity_bytes():
    """Physical VMEM capacity; conservative 64 MiB fallback (v7x per-TC)."""
    try:
        info = pltpu.get_tpu_info()
        cap = getattr(info, "vmem_capacity_bytes", None)
        if cap:
            return int(cap)
    except Exception:
        pass
    return 64 << 20


def _qdq_kernel(x_ref, scales_ref, o_ref):
    """Quantize to fp8 e4m3 (x * scale_inv), dequantize back (q * scale)."""
    s = scales_ref[0]        # scale
    inv = scales_ref[1]      # scale_inv (precomputed on host — exact parity)
    x = x_ref[...]
    if x.dtype != jnp.float32:        # static: no cast emitted for f32 inputs
        x = x.astype(jnp.float32)
    # Saturate to the e4m3 representable range (cast_to_fp8 semantics; the raw
    # f32->e4m3fn convert is non-saturating, overflow -> NaN).
    xs = jnp.clip(x * inv, -FP8_E4M3_MAX, FP8_E4M3_MAX)
    q = xs.astype(LP_DTYPE)                                   # quantize (lp_dtype)
    o_ref[...] = (q.astype(jnp.float32) * s).astype(o_ref.dtype)   # dequantize


def _qdq_xla(x, scale, scale_inv):
    """Plain-XLA quant-dequant for the tiny (< lane_w) ragged remainder."""
    xs = jnp.clip(x.astype(jnp.float32) * scale_inv, -FP8_E4M3_MAX, FP8_E4M3_MAX)
    q = xs.astype(LP_DTYPE)
    return (q.astype(jnp.float32) * scale).astype(x.dtype)


def quant_dequant(x, scale, scale_inv=None):
    """x: any-shape hp_dtype tensor (e.g. NCHW). scale / scale_inv: scalar fp32."""
    orig_shape = x.shape
    out_dtype = x.dtype
    total = int(x.size)
    itemsize = jnp.dtype(out_dtype).itemsize

    scale = jnp.asarray(scale, jnp.float32).reshape(())
    if scale_inv is None:
        # NOTE: neural_compressor stores scale_inv; passing it explicitly gives
        # exact bit parity. Computed once here (outside the kernel) otherwise.
        scale_inv = 1.0 / scale
    scale_inv = jnp.asarray(scale_inv, jnp.float32).reshape(())
    scales = jnp.stack([scale, scale_inv])        # (2,) f32 -> SMEM

    if total == 0:
        return x

    xf = x.reshape(-1)

    # Widest lane-dense layout that divides the tensor -> zero-copy main path.
    lane_w = next((w for w in (512, 256, 128) if total % w == 0), 512)
    rows = total // lane_w
    rem = total - rows * lane_w

    pieces = []
    if rows > 0:
        main = rows * lane_w
        x2 = (xf if rem == 0 else xf[:main]).reshape(rows, lane_w)

        vmem_cap = _vmem_capacity_bytes()
        if vmem_cap >= (100 << 20):          # v5e / v6e: 128 MiB physical VMEM
            target_block_bytes = 8 << 20
            vmem_limit = 48 << 20
        else:                                # v7x: 64 MiB per TensorCore
            target_block_bytes = 4 << 20
            vmem_limit = 32 << 20

        # Size blocks by bytes (dtype-aware), multiple of 8 sublanes.
        max_block_rows = max(8, (target_block_bytes // (lane_w * itemsize)) // 8 * 8)
        # Aim for >= 4 grid steps so a parallel grid can shard across v7x's 2 TCs.
        desired = max(8, _round_up(_cdiv(rows, 4), 8))
        block_rows = min(max_block_rows, desired)
        if block_rows > rows:                # tiny tensor: one full-extent block
            block_rows = rows
        grid = (_cdiv(rows, block_rows),)    # partial final block is masked

        cost = pl.CostEstimate(
            flops=4 * main,
            transcendentals=0,
            bytes_accessed=2 * main * itemsize + 8,
        )

        out_main = pl.pallas_call(
            _qdq_kernel,
            out_shape=jax.ShapeDtypeStruct((rows, lane_w), out_dtype),
            grid=grid,
            in_specs=[
                pl.BlockSpec((block_rows, lane_w), lambda i: (i, 0)),
                pl.BlockSpec(memory_space=pltpu.MemorySpace.SMEM),   # [scale, scale_inv]
            ],
            out_specs=pl.BlockSpec((block_rows, lane_w), lambda i: (i, 0)),
            compiler_params=pltpu.CompilerParams(
                dimension_semantics=("parallel",),
                vmem_limit_bytes=vmem_limit,
            ),
            cost_estimate=cost,
        )(x2, scales)
        pieces.append(out_main.reshape(-1))

    if rem > 0:
        # < lane_w trailing elements: trivial XLA expression, no whole-tensor pad.
        pieces.append(_qdq_xla(xf[rows * lane_w:], scale, scale_inv))

    out_flat = pieces[0] if len(pieces) == 1 else jnp.concatenate(pieces)
    return out_flat.reshape(orig_shape)


def _reference(x, scale):
    s = jnp.float32(scale)
    inv = 1.0 / s
    xs = jnp.clip(x.astype(jnp.float32) * inv, -FP8_E4M3_MAX, FP8_E4M3_MAX)
    q = xs.astype(LP_DTYPE)
    return (q.astype(jnp.float32) * s).astype(x.dtype)


if __name__ == "__main__":
    key = jax.random.PRNGKey(0)
    scale = jnp.float32(0.5)   # deterministic synthetic quantization scale

    # 1) NCHW input: batch=2, channels=4, spatial=16x16 (total divisible by 512
    #    -> zero-copy lane-dense path).
    k0, k1 = jax.random.split(key)
    x = jax.random.normal(k0, (2, 4, 16, 16), dtype=HP_DTYPE) * 3.0
    out = jax.block_until_ready(quant_dequant(x, scale))
    ref = _reference(x, scale)
    assert out.shape == x.shape and out.dtype == x.dtype
    assert jnp.allclose(out, ref, atol=1e-6), "f32 mismatch vs reference qdq"

    # 2) Ragged shape (total=1155): exercises kernel main path + XLA tail path.
    xr = jax.random.normal(k1, (3, 5, 7, 11), dtype=HP_DTYPE) * 3.0
    out_r = jax.block_until_ready(quant_dequant(xr, scale))
    ref_r = _reference(xr, scale)
    assert out_r.shape == xr.shape and out_r.dtype == xr.dtype
    assert jnp.allclose(out_r, ref_r, atol=1e-6), "ragged mismatch vs reference"

    # 3) bf16 hp_dtype (dtype-generic, byte-sized blocks).
    xb = (jax.random.normal(k0, (2, 4, 16, 16), dtype=jnp.float32) * 3.0).astype(jnp.bfloat16)
    out_b = jax.block_until_ready(quant_dequant(xb, scale))
    ref_b = _reference(xb, scale)
    assert out_b.shape == xb.shape and out_b.dtype == jnp.bfloat16
    assert jnp.allclose(out_b.astype(jnp.float32), ref_b.astype(jnp.float32),
                        atol=1e-2), "bf16 mismatch vs reference"

    print("KERNEL_OK")
</pallas_src>

<mosaic_0001>
module attributes {stable_mosaic.version = 11 : i64} {
  func.func @_qdq_kernel(%arg0: i32, %arg1: memref<4x512xf32, #tpu.memory_space<vmem>>, %arg2: memref<2xf32, #tpu.memory_space<smem>>, %arg3: memref<4x512xf32, #tpu.memory_space<vmem>>) attributes {dimension_semantics = [#tpu.dimension_semantics<parallel>], iteration_bounds = array<i64: 1>, scalar_prefetch = 0 : i64, scratch_operands = 0 : i64, tpu.core_type = #tpu.core_type<tc>, window_params = [{transform_indices = @transform_0, window_bounds = array<i64: 4, 512>}, {transform_indices = @transform_1, window_bounds = array<i64: 2>}, {transform_indices = @transform_2, window_bounds = array<i64: 4, 512>}]} {
    %c0 = arith.constant 0 : index
    %0 = memref.load %arg2[%c0] : memref<2xf32, #tpu.memory_space<smem>>
    %c1 = arith.constant 1 : index
    %1 = memref.load %arg2[%c1] : memref<2xf32, #tpu.memory_space<smem>>
    %c0_0 = arith.constant 0 : index
    %c0_1 = arith.constant 0 : index
    %2 = vector.load %arg1[%c0_0, %c0_1] : memref<4x512xf32, #tpu.memory_space<vmem>>, vector<4x512xf32>
    %3 = vector.broadcast %1 : f32 to vector<4x512xf32>
    %4 = arith.mulf %2, %3 : vector<4x512xf32>
    %cst = arith.constant -4.480000e+02 : f32
    %cst_2 = arith.constant 4.480000e+02 : f32
    %5 = vector.broadcast %cst : f32 to vector<4x512xf32>
    %6 = arith.maximumf %5, %4 : vector<4x512xf32>
    %7 = vector.broadcast %cst_2 : f32 to vector<4x512xf32>
    %8 = arith.minimumf %7, %6 : vector<4x512xf32>
    %9 = arith.truncf %8 : vector<4x512xf32> to vector<4x512xf8E4M3FN>
    %10 = arith.extf %9 : vector<4x512xf8E4M3FN> to vector<4x512xf32>
    %11 = vector.broadcast %0 : f32 to vector<4x512xf32>
    %12 = arith.mulf %10, %11 : vector<4x512xf32>
    %c0_3 = arith.constant 0 : index
    %c0_4 = arith.constant 0 : index
    %13 = vector.load %arg3[%c0_3, %c0_4] : memref<4x512xf32, #tpu.memory_space<vmem>>, vector<4x512xf32>
    tpu.vector_store %arg3[%c0_3, %c0_4], %12 {strides = array<i32>} : memref<4x512xf32, #tpu.memory_space<vmem>>, vector<4x512xf32>,
    return
  }
  func.func @transform_0(%arg0: i32) -> (i32, i32) {
    %c0_i32 = arith.constant 0 : i32
    %c0_i32_0 = arith.constant 0 : i32
    return %arg0, %c0_i32 : i32, i32
  }
  func.func @transform_1(%arg0: i32) -> i32 {
    %c0_i32 = arith.constant 0 : i32
    %c0_i32_0 = arith.constant 0 : i32
    return %c0_i32 : i32
  }
  func.func @transform_2(%arg0: i32) -> (i32, i32) {
    %c0_i32 = arith.constant 0 : i32
    %c0_i32_0 = arith.constant 0 : i32
    return %arg0, %c0_i32 : i32, i32
  }
}

</mosaic_0001>

<bundles_post_ra>
// kernel: tpu_custom_call.1
= control target key start
LH: loop header
LB: loop body
LE: loop exit
PB: predicated region body
PF: predicated region fallthrough
CT: control target
= control target key end

     0   :  { %7 = vsyncpa [#allocation3], 0  ;;  %s226_s0 = inlined_call_operand.hbm [shape: f32[4,512], index: 0, kind: input, shape index: {}]   ;;  %s227_s1 = inlined_call_operand.vmem [shape: f32[2], index: 1, kind: input, shape index: {}]   ;;  %s228_s2 = inlined_call_operand.hbm [shape: f32[4,512], index: 2, kind: output, shape index: {}]  }
   0x1   :  { %8 = vsyncpa [#allocation5], 0 }
   0x2   :  { %9 = vsyncpa [#allocation4], 0  ;;  %s26_s11 = sshll.u32 %s227_s1, 4  ;;  %s181_s12 = smov [#allocation2]   ;;  %s27_s11 = int_to_ptr.vmem [resolvable:$true] %s26_s11 }
   0x3   :  { %s16_s13 = sshll.u32 %s181_s12, 4  ;;  %s119_s16 = scalar_lea.hbm %s226_s0, 256  ;;  %s17_s13 = int_to_ptr.vmem [resolvable:$true] %s16_s13 }
   0x4   :  { %p120_p0 = scmp.ne.s32.totalorder %s226_s0, %s119_s16  ;;  %p123_p1 = scmp.lt.u32.totalorder %s119_s16, %s226_s0 }
   0x6   :  { %p125_p2 = pnand %p123_p1, %p120_p0 }
   0x8   :  { %128 = shalt.err (!%p125_p2)
}
   0x9   :  { %s129_s21 = scalar_lea.vmem %s17_s13, 256  ;;  %p134_p4 = scmp.lt.s32.totalorder %s17_s13, %s17_s13 }
   0xa   :  { %p130_p3 = scmp.ne.s32.totalorder %s17_s13, %s129_s21  ;;  %p135_p5 = scmp.lt.s32.totalorder %s129_s21, %s129_s21 }
   0xc   :  { %p136_p6 = por %p135_p5, %p134_p4 }
   0xe   :  { %p137_p7 = pnand %p136_p6, %p130_p3 }
  0x10   :  { %140 = shalt.err (!%p137_p7)
}
  0x11   :  { %19 = dma.hbm_to_vmem [thread:$0]  %s226_s0, 256, %s17_s13, [#allocation3]  }
  0x12   :  { %s141_s23 = scalar_lea.vmem %s27_s11, 16  ;;  %p146_p9 = scmp.lt.s32.totalorder %s27_s11, %s27_s11 }
  0x13   :  { %p142_p8 = scmp.ne.s32.totalorder %s27_s11, %s141_s23  ;;  %p147_p10 = scmp.lt.s32.totalorder %s141_s23, %s141_s23 }
  0x15   :  { %p148_p11 = por %p147_p10, %p146_p9 }
  0x17   :  { %p149_p12 = pnand %p148_p11, %p142_p8 }
  0x19   :  { %152 = shalt.err (!%p149_p12)
}
  0x1a   :  { %s182_s24 = smov [#allocation6]  }
  0x1b   :  { %29 = dma.vmem_to_smem %s27_s11, 16, %s182_s24, [#allocation5]  }
  0x1c   :  { %175 = dma.done.wait [#allocation3], 256  }
  0x1d   :  { %176 = vsyncadd [#allocation3], 4294967040 }
  0x1e   :  { %177 = dma.done.wait [#allocation5], 16  }
  0x1f   :  { %178 = vsyncadd [#allocation5], 4294967280 }
  0x20   :  { %36 = sfence }
  0x21   :  { %s113_s25 = sld [smem:[#allocation6 + $0x1]]  ;;  %v39_v0 = vld [vmem:[#allocation2] sm:$0xff]  ;;  %v40_v1 = vld [vmem:[#allocation2 + $0x8] sm:$0xff]  ;;  %s37_s26 = sld [smem:[#allocation6]] }
  0x22   :  { %s183_s0 = smov [#allocation7]  }
  0x23   :  { %s103_s27 = sshll.u32 %s183_s0, 4  ;;  %s104_s27 = int_to_ptr.vmem [resolvable:$true] %s103_s27 }
  0x24   :  { %s153_s28 = scalar_lea.vmem %s104_s27, 256  ;;  %p158_p0 = scmp.lt.s32.totalorder %s104_s27, %s104_s27 }
  0x25   :  { %p154_p13 = scmp.ne.s32.totalorder %s104_s27, %s153_s28  ;;  %p159_p1 = scmp.lt.s32.totalorder %s153_s28, %s153_s28 }
  0x27   :  { %v41_v2 = vstv %s113_s25  ;;  %v82_v15 = vstv %s37_s26  ;;  %p160_p2 = por %p159_p1, %p158_p0 }
  0x28   :  { %v42_v3 = vmul.f32 %v41_v2, %v39_v0  ;;  %v43_v4 = vmul.f32 %v41_v2, %v40_v1 }
  0x29   :  { %p161_p3 = pnand %p160_p2, %p154_p13 }
  0x2a   :  { %v114_v5 = vclamps-f32 %v42_v3, 448.0  ;;  %v115_v6 = vclamps-f32 %v43_v4, 448.0 }
  0x2c   :  { %v50_v7 = vcombine.high %v114_v5, %v114_v5  ;;  %v54_v8 = vpack.c.f32.eXmY %v114_v5, %v114_v5, 61788  ;;  %v51_v9 = vcombine.high %v115_v6, %v115_v6  ;;  %v66_v10 = vpack.c.f32.eXmY %v115_v6, %v115_v6, 61788 }
  0x2e   :  { %v58_v11 = vpack.c.b8 %v54_v8, %v54_v8  ;;  %v60_v12 = vpack.c.f32.eXmY %v50_v7, %v50_v7, 61788  ;;  %v70_v13 = vpack.c.b8 %v66_v10, %v66_v10  ;;  %v72_v14 = vpack.c.f32.eXmY %v51_v9, %v51_v9, 61788 }
  0x30   :  { %v64_v16 = vpack.c.b8 %v60_v12, %v60_v12  ;;  %v78_v17 = vunpack.c.0.f8e4m3fn %v58_v11  ;;  %v76_v18 = vpack.c.b8 %v72_v14, %v72_v14  ;;  %v80_v19 = vunpack.c.0.f8e4m3fn %v70_v13 }
  0x32   :  { %v79_v20 = vunpack.c.0.f8e4m3fn %v64_v16  ;;  %v83_v21 = vmul.f32 %v82_v15, %v78_v17  ;;  %v81_v22 = vunpack.c.0.f8e4m3fn %v76_v18  ;;  %v85_v23 = vmul.f32 %v82_v15, %v80_v19 }
  0x34   :  { %v84_v24 = vmul.f32 %v82_v15, %v79_v20  ;;  %v86_v25 = vmul.f32 %v82_v15, %v81_v22 }
  0x36   :  { %v91_v26 = vcombine.low %v83_v21, %v84_v24  ;;  %v92_v27 = vcombine.low %v85_v23, %v86_v25 }
  0x38   :  { %95 = vst [vmem:[#allocation7] sm:$0xff] %v91_v26  ;;  %96 = vst [vmem:[#allocation7 + $0x8] sm:$0xff] %v92_v27 }
  0x39   :  { %164 = shalt.err (!%p161_p3)
}
  0x3a   :  { %s165_s3 = scalar_lea.hbm %s228_s2, 256 }
  0x3b   :  { %p166_p4 = scmp.ne.s32.totalorder %s228_s2, %s165_s3  ;;  %p169_p5 = scmp.lt.u32.totalorder %s165_s3, %s228_s2 }
  0x3d   :  { %p171_p6 = pnand %p169_p5, %p166_p4 }
  0x3f   :  { %174 = shalt.err (!%p171_p6)
}
  0x40   :  { %106 = dma.vmem_to_hbm [thread:$0]  %s104_s27, 256, %s228_s2, [#allocation4]  }
  0x41   :  { %179 = dma.done.wait [#allocation4], 256  }
  0x42   :  { %180 = vsyncadd [#allocation4], 4294967040 }
  0x43   :  { %110 = vsyncpa [#allocation3], 1 }
  0x44   :  { %111 = vsyncpa [#allocation4], 1 }
  0x45   :  { %112 = vsyncpa [#allocation5], 1 }

</bundles_post_ra>
